<compile_context>
chip_gen: v6e
topology: v6e:2x2x1
jax: 0.10.0
libtpu: 0.0.40
codegen_flags: <defaults>
</compile_context>

<pallas_src>
import functools

import jax
import jax.numpy as jnp
from jax import lax
from jax.experimental import pallas as pl
from jax.experimental.pallas import tpu as pltpu


# --------------------------------------------------------------------------
# Kernels
# --------------------------------------------------------------------------
def _simam_row_kernel(epsilon, x_ref, o_ref):
    """Fast path. x_ref/o_ref: (block_rows, H*W); one row = one (n, c) map."""
    x = x_ref[...].astype(jnp.float32)
    mean = jnp.mean(x, axis=-1, keepdims=True)        # XLU lane reduction
    xc = x - mean
    var = jnp.mean(xc * xc, axis=-1, keepdims=True)
    inv_std = lax.rsqrt(var + epsilon)                 # EUP: separate issue slot
    o_ref[...] = (xc * inv_std).astype(o_ref.dtype)


def _simam_stats_kernel(hw_total, bhw, x_ref, sum_ref, sq_ref):
    """Fallback pass 1: per-row sum / sum-of-squares over a split H*W axis.

    Grid = (row_blocks, hw_blocks); hw axis is the ("arbitrary") reduction
    axis, with the (block_rows, 1) outputs staying resident as accumulators.
    """
    j = pl.program_id(1)

    @pl.when(j == 0)
    def _():
        sum_ref[...] = jnp.zeros_like(sum_ref)
        sq_ref[...] = jnp.zeros_like(sq_ref)

    x = x_ref[...].astype(jnp.float32)
    # Mask lanes past the true end of the row (ragged last H*W block).
    col = lax.broadcasted_iota(jnp.int32, x.shape, 1) + j * bhw
    x = jnp.where(col < hw_total, x, 0.0)
    sum_ref[...] += jnp.sum(x, axis=-1, keepdims=True)
    sq_ref[...] += jnp.sum(x * x, axis=-1, keepdims=True)


def _simam_apply_kernel(epsilon, inv_n, x_ref, sum_ref, sq_ref, o_ref):
    """Fallback pass 2: elementwise normalization with the per-row stats."""
    x = x_ref[...].astype(jnp.float32)
    mean = sum_ref[...] * inv_n
    var = jnp.maximum(sq_ref[...] * inv_n - mean * mean, 0.0)
    inv_std = lax.rsqrt(var + epsilon)
    o_ref[...] = ((x - mean) * inv_std).astype(o_ref.dtype)


# --------------------------------------------------------------------------
# Wrapper
# --------------------------------------------------------------------------
def _round_down(x, m):
    return (x // m) * m


def _vmem_limit_bytes():
    """Per-generation scoped-VMEM limit: ~3/4 of per-core physical VMEM."""
    phys = 64 * 1024 * 1024            # conservative fallback (= v7x per TC)
    try:
        phys = int(pltpu.get_tpu_info().vmem_capacity_bytes)
    except Exception:
        pass
    limit = (phys * 3) // 4            # v5e/v6e -> 96 MiB, v7x -> 48 MiB
    return max(32 * 1024 * 1024, min(limit, 96 * 1024 * 1024))


def simam(x, epsilon=1e-5, *, block_rows=None, max_block_bytes=None,
          donate_input=False):
    """SimAM forward for an NCHW array using Pallas TPU kernels."""
    n, c, h, w = x.shape
    rows = n * c
    hw = h * w
    dtype = x.dtype
    itemsize = jnp.dtype(dtype).itemsize
    sublane = max(8, 32 // itemsize)          # f32: 8, bf16: 16, int8/fp8: 32
    lane = 128

    vmem_limit = _vmem_limit_bytes()
    if max_block_bytes is None:
        # Per pipeline-buffer budget in f32-expanded bytes; ~8 live tiles
        # (2 in + 2 out buffers + elementwise temporaries) must fit the limit.
        max_block_bytes = min(8 * 1024 * 1024, vmem_limit // 8)

    # Lane-dense view: spatial dims flattened onto the last (lane) axis.
    x2 = x.reshape(rows, hw)
    row_bytes_f32 = hw * 4
    io_alias = {0: 0} if donate_input else {}

    min_tile_rows = rows if rows < sublane else sublane

    # ---------------- Fast path: a tile holds the full H*W of each row -----
    if block_rows is not None or min_tile_rows * row_bytes_f32 <= max_block_bytes:
        if block_rows is None:
            if rows <= sublane:
                block_rows = rows                      # full dim, grid=(1,)
            else:
                fit = max(sublane,
                          _round_down(max_block_bytes // row_bytes_f32, sublane))
                # Keep >= 4 grid steps when the row count allows it: overlaps
                # DMA with compute and lets v7x shard across both TensorCores.
                min_steps = 4
                if rows >= min_steps * sublane:
                    fit = min(fit, max(sublane,
                                       _round_down(rows // min_steps, sublane)))
                block_rows = min(rows, fit)

        grid = (pl.cdiv(rows, block_rows),)
        cost = pl.CostEstimate(
            flops=5 * rows * hw,
            transcendentals=rows,
            bytes_accessed=2 * rows * hw * itemsize,
        )
        out2 = pl.pallas_call(
            functools.partial(_simam_row_kernel, float(epsilon)),
            out_shape=jax.ShapeDtypeStruct((rows, hw), dtype),
            grid=grid,
            in_specs=[pl.BlockSpec((block_rows, hw), lambda i: (i, 0))],
            out_specs=pl.BlockSpec((block_rows, hw), lambda i: (i, 0)),
            compiler_params=pltpu.CompilerParams(
                dimension_semantics=("parallel",),
                vmem_limit_bytes=vmem_limit),
            cost_estimate=cost,
            input_output_aliases=io_alias,
        )(x2)
        return out2.reshape(n, c, h, w)

    # ---------------- Fallback: H*W too large for one tile -> two passes ---
    br = rows if rows < sublane else sublane
    bhw = max(lane, _round_down(max_block_bytes // (br * 4), lane))
    if bhw >= hw:
        bhw = hw
    row_blocks = pl.cdiv(rows, br)
    hw_blocks = pl.cdiv(hw, bhw)

    stats_cost = pl.CostEstimate(
        flops=3 * rows * hw,
        transcendentals=0,
        bytes_accessed=rows * hw * itemsize + 2 * rows * 4,
    )
    sums, sqs = pl.pallas_call(
        functools.partial(_simam_stats_kernel, hw, bhw),
        out_shape=(jax.ShapeDtypeStruct((rows, 1), jnp.float32),
                   jax.ShapeDtypeStruct((rows, 1), jnp.float32)),
        grid=(row_blocks, hw_blocks),
        in_specs=[pl.BlockSpec((br, bhw), lambda i, j: (i, j))],
        out_specs=(pl.BlockSpec((br, 1), lambda i, j: (i, 0)),
                   pl.BlockSpec((br, 1), lambda i, j: (i, 0))),
        compiler_params=pltpu.CompilerParams(
            dimension_semantics=("parallel", "arbitrary"),
            vmem_limit_bytes=vmem_limit),
        cost_estimate=stats_cost,
    )(x2)

    apply_cost = pl.CostEstimate(
        flops=5 * rows * hw,
        transcendentals=rows,
        bytes_accessed=2 * rows * hw * itemsize,
    )
    out2 = pl.pallas_call(
        functools.partial(_simam_apply_kernel, float(epsilon), 1.0 / float(hw)),
        out_shape=jax.ShapeDtypeStruct((rows, hw), dtype),
        grid=(row_blocks, hw_blocks),
        in_specs=[pl.BlockSpec((br, bhw), lambda i, j: (i, j)),
                  pl.BlockSpec((br, 1), lambda i, j: (i, 0)),
                  pl.BlockSpec((br, 1), lambda i, j: (i, 0))],
        out_specs=pl.BlockSpec((br, bhw), lambda i, j: (i, j)),
        compiler_params=pltpu.CompilerParams(
            dimension_semantics=("parallel", "parallel"),
            vmem_limit_bytes=vmem_limit),
        cost_estimate=apply_cost,
        input_output_aliases=io_alias,
    )(x2, sums, sqs)
    return out2.reshape(n, c, h, w)


class SimAM:
    """JAX/Pallas equivalent of the PyTorch SimAM module (spec semantics)."""

    def __init__(self, epsilon=1e-5):
        self.epsilon = epsilon

    def __call__(self, x):
        return simam(x, epsilon=self.epsilon)


# --------------------------------------------------------------------------
# Self-test
# --------------------------------------------------------------------------
if __name__ == "__main__":
    def reference(x, eps):
        mean = jnp.mean(x, axis=(2, 3), keepdims=True)
        var = jnp.mean((x - mean) ** 2, axis=(2, 3), keepdims=True)
        return (x - mean) / jnp.sqrt(var + eps)

    key = jax.random.PRNGKey(0)

    # 1) Fast path: whole H*W row inside one tile.
    x1 = jax.random.normal(key, (2, 4, 16, 16), dtype=jnp.float32)
    module = SimAM(epsilon=1e-5)
    out1 = jax.block_until_ready(module(x1))
    ref1 = reference(x1, 1e-5)
    assert out1.shape == ref1.shape and out1.dtype == ref1.dtype
    err1 = float(jnp.max(jnp.abs(out1 - ref1)))
    assert bool(jnp.allclose(out1, ref1, atol=1e-4, rtol=1e-4)), err1

    # 2) Large-H*W fallback (two-pass, split H*W axis), forced via a tiny
    #    per-buffer budget; hw=200 gives a ragged last lane block to exercise
    #    the column mask.
    x2 = jax.random.normal(jax.random.PRNGKey(0), (2, 4, 10, 20),
                           dtype=jnp.float32)
    out2 = jax.block_until_ready(simam(x2, epsilon=1e-5, max_block_bytes=4096))
    ref2 = reference(x2, 1e-5)
    err2 = float(jnp.max(jnp.abs(out2 - ref2)))
    assert bool(jnp.allclose(out2, ref2, atol=1e-4, rtol=1e-4)), err2

    print("KERNEL_OK")
</pallas_src>

<mosaic_0001>
module attributes {stable_mosaic.version = 11 : i64} {
  func.func @_simam_row_kernel(%arg0: i32, %arg1: memref<8x256xf32, #tpu.memory_space<vmem>>, %arg2: memref<8x256xf32, #tpu.memory_space<vmem>>) attributes {dimension_semantics = [#tpu.dimension_semantics<parallel>], iteration_bounds = array<i64: 1>, scalar_prefetch = 0 : i64, scratch_operands = 0 : i64, tpu.core_type = #tpu.core_type<tc>, window_params = [{transform_indices = @transform_0, window_bounds = array<i64: 8, 256>}, {transform_indices = @transform_1, window_bounds = array<i64: 8, 256>}]} {
    %c0 = arith.constant 0 : index
    %c0_0 = arith.constant 0 : index
    %0 = vector.load %arg1[%c0, %c0_0] : memref<8x256xf32, #tpu.memory_space<vmem>>, vector<8x256xf32>
    %cst = arith.constant dense<0.000000e+00> : vector<8xf32>
    %1 = vector.multi_reduction <add>, %0, %cst [1] : vector<8x256xf32> to vector<8xf32>
    %2 = vector.shape_cast %1 : vector<8xf32> to vector<8x1xf32>
    %cst_1 = arith.constant 2.560000e+02 : f32
    %3 = vector.broadcast %cst_1 : f32 to vector<8x1xf32>
    %4 = arith.divf %2, %3 : vector<8x1xf32>
    %5 = vector.broadcast %4 : vector<8x1xf32> to vector<8x256xf32>
    %6 = arith.subf %0, %5 : vector<8x256xf32>
    %7 = arith.mulf %6, %6 : vector<8x256xf32>
    %cst_2 = arith.constant dense<0.000000e+00> : vector<8xf32>
    %8 = vector.multi_reduction <add>, %7, %cst_2 [1] : vector<8x256xf32> to vector<8xf32>
    %9 = vector.shape_cast %8 : vector<8xf32> to vector<8x1xf32>
    %cst_3 = arith.constant 2.560000e+02 : f32
    %10 = vector.broadcast %cst_3 : f32 to vector<8x1xf32>
    %11 = arith.divf %9, %10 : vector<8x1xf32>
    %cst_4 = arith.constant 9.99999974E-6 : f32
    %12 = vector.broadcast %cst_4 : f32 to vector<8x1xf32>
    %13 = arith.addf %11, %12 : vector<8x1xf32>
    %14 = math.rsqrt %13 : vector<8x1xf32>
    %15 = vector.broadcast %14 : vector<8x1xf32> to vector<8x256xf32>
    %16 = arith.mulf %6, %15 : vector<8x256xf32>
    %c0_5 = arith.constant 0 : index
    %c0_6 = arith.constant 0 : index
    %17 = vector.load %arg2[%c0_5, %c0_6] : memref<8x256xf32, #tpu.memory_space<vmem>>, vector<8x256xf32>
    tpu.vector_store %arg2[%c0_5, %c0_6], %16 {strides = array<i32>} : memref<8x256xf32, #tpu.memory_space<vmem>>, vector<8x256xf32>,
    return
  }
  func.func @transform_0(%arg0: i32) -> (i32, i32) {
    %c0_i32 = arith.constant 0 : i32
    %c0_i32_0 = arith.constant 0 : i32
    return %arg0, %c0_i32 : i32, i32
  }
  func.func @transform_1(%arg0: i32) -> (i32, i32) {
    %c0_i32 = arith.constant 0 : i32
    %c0_i32_0 = arith.constant 0 : i32
    return %arg0, %c0_i32 : i32, i32
  }
}

</mosaic_0001>

<bundles_post_ra>
// kernel: tpu_custom_call.1
= control target key start
LH: loop header
LB: loop body
LE: loop exit
PB: predicated region body
PF: predicated region fallthrough
CT: control target
= control target key end

     0   :  { %6 = vsyncpa [#allocation3], 0  ;;  %s123_s0 = inlined_call_operand.hbm [shape: f32[8,256], index: 0, kind: input, shape index: {}]   ;;  %s124_s1 = inlined_call_operand.hbm [shape: f32[8,256], index: 1, kind: output, shape index: {}]  }
   0x1   :  { %7 = vsyncpa [#allocation4], 0  ;;  %s105_s6 = smov [#allocation2]  }
   0x2   :  { %s14_s7 = sshll.u32 %s105_s6, 4  ;;  %s15_s7 = int_to_ptr.vmem [resolvable:$true] %s14_s7 }
   0x3   :  { %s69_s8 = scalar_lea.vmem %s15_s7, 256  ;;  %p74_p1 = scmp.lt.s32.totalorder %s15_s7, %s15_s7 }
   0x4   :  { %p70_p0 = scmp.ne.s32.totalorder %s15_s7, %s69_s8  ;;  %p75_p2 = scmp.lt.s32.totalorder %s69_s8, %s69_s8 }
   0x6   :  { %p76_p3 = por %p75_p2, %p74_p1 }
   0x8   :  { %p77_p4 = pnand %p76_p3, %p70_p0 }
   0xa   :  { %80 = shalt.err (!%p77_p4)
}
   0xb   :  { %17 = dma.hbm_to_vmem [thread:$0]  %s123_s0, 256, %s15_s7, [#allocation3]  }
   0xc   :  { %101 = dma.done.wait [#allocation3], 256  }
   0xd   :  { %102 = vsyncadd [#allocation3], 4294967040  ;;  %v21_v0 = vld [vmem:[#allocation2] sm:$0xff]  ;;  %v22_v1 = vld [vmem:[#allocation2 + $0x8] sm:$0xff]  ;;  %s106_s11 = smov [#allocation5]  }
   0xe   :  { %v23_v2 = vadd.f32 %v22_v1, %v21_v0  ;;  %s48_s0 = sshll.u32 %s106_s11, 4  ;;  %s49_s0 = int_to_ptr.vmem [resolvable:$true] %s48_s0 }
   0xf   :  { %s81_s12 = scalar_lea.vmem %s49_s0, 256  ;;  %p86_p6 = scmp.lt.s32.totalorder %s49_s0, %s49_s0 }
  0x10   :  { %24 = vadd.xlane.f32.xlu0 %v23_v2  ;;  %p82_p5 = scmp.ne.s32.totalorder %s49_s0, %s81_s12  ;;  %p87_p7 = scmp.lt.s32.totalorder %s81_s12, %s81_s12 }
  0x12   :  { %p88_p8 = por %p87_p7, %p86_p6 }
  0x14   :  { %p89_p9 = pnand %p88_p8, %p82_p5 }
  0x99   :  { %v25_v3 = vpop.xlane.xlu0 %24 }
  0x9a   :  { %v27_v4 = vmul.f32 0.00390625, %v25_v3 }
  0x9c   :  { %v28_v5 = vsub.f32 %v21_v0, %v27_v4  ;;  %v29_v6 = vsub.f32 %v22_v1, %v27_v4 }
  0x9e   :  { %v30_v7 = vmul.f32 %v28_v5, %v28_v5  ;;  %v31_v8 = vmul.f32 %v29_v6, %v29_v6 }
  0xa0   :  { %v32_v9 = vadd.f32 %v31_v8, %v30_v7 }
  0xa2   :  { %33 = vadd.xlane.f32.xlu0 %v32_v9 }
 0x12b   :  { %v34_v10 = vpop.xlane.xlu0 %33 }
 0x12c   :  { %v35_v11 = vmul.f32 0.00390625, %v34_v10 }
 0x12e   :  { %v36_v12 = vadd.f32 1e-05, %v35_v11 }
 0x130   :  { %59 = vrsqrt.f32 %v36_v12 }
 0x13d   :  { %v60_v13 = vpop.eup %59 }
 0x13e   :  { %v38_v14 = vmul.f32 %v60_v13, %v28_v5  ;;  %v39_v15 = vmul.f32 %v60_v13, %v29_v6 }
 0x140   :  { %40 = vst [vmem:[#allocation5] sm:$0xff] %v38_v14  ;;  %41 = vst [vmem:[#allocation5 + $0x8] sm:$0xff] %v39_v15 }
 0x141   :  { %92 = shalt.err (!%p89_p9)
}
 0x142   :  { %51 = dma.vmem_to_hbm [thread:$0]  %s49_s0, 256, %s124_s1, [#allocation4]  }
 0x143   :  { %103 = dma.done.wait [#allocation4], 256  }
 0x144   :  { %104 = vsyncadd [#allocation4], 4294967040 }
 0x145   :  { %55 = vsyncpa [#allocation3], 1 }
 0x146   :  { %56 = vsyncpa [#allocation4], 1 }

</bundles_post_ra>
